<compile_context>
chip_gen: v6e
topology: v6e:2x2x1
jax: 0.10.0
libtpu: 0.0.40
codegen_flags: <defaults>
</compile_context>

<pallas_src>
import functools

import jax
import jax.numpy as jnp
import numpy as np
from jax.experimental import pallas as pl
from jax.experimental.pallas import tpu as pltpu


# ----------------------------- Pallas kernel --------------------------------
def rope_attn_kernel(x_ref, wqkv_ref, cos_ref, sina_ref, sinb_ref, wo_ref, bo_ref,
                     o_ref, out_acc, *, heads, dim_heads, inner, b_tile, n):
    d = dim_heads
    rows = b_tile * n
    dim = x_ref.shape[-1]

    # In-kernel bf16 cast of x (VPU) — no wrapper-side cast pass over HBM.
    x = x_ref[...].reshape(rows, dim).astype(jnp.bfloat16)

    # One fused QKV projection on the MXU, f32 accumulation.
    qkv = jnp.dot(x, wqkv_ref[...], preferred_element_type=jnp.float32)  # (rows, 3*inner)

    # Retire V immediately as bf16 so the full f32 qkv slab does not stay live.
    v = qkv[:, 2 * inner:].astype(jnp.bfloat16)                          # (rows, inner)
    q = qkv[:, :inner]                                                   # (rows, inner) f32
    k = qkv[:, inner:2 * inner]

    # Full-width RoPE across all heads at once (natural interleaved layout):
    #   even lane 2j:   r*cos - i*sin
    #   odd  lane 2j+1: i*cos + r*sin
    # The pairwise partner comes from two lane rolls; cyclic wrap-around lanes
    # are multiplied by zeros baked into sin_a / sin_b.
    cos = cos_ref[...].astype(jnp.float32)
    sin_a = sina_ref[...].astype(jnp.float32)   # +sin on odd lanes, 0 on even
    sin_b = sinb_ref[...].astype(jnp.float32)   # -sin on even lanes, 0 on odd
    if b_tile > 1:
        cos = jnp.tile(cos, (b_tile, 1))
        sin_a = jnp.tile(sin_a, (b_tile, 1))
        sin_b = jnp.tile(sin_b, (b_tile, 1))

    def rope(t):  # (rows, inner) f32 -> rotated, 3 FMAs + 2 XLU rolls
        return (t * cos
                + pltpu.roll(t, 1, axis=1) * sin_a
                + pltpu.roll(t, inner - 1, axis=1) * sin_b)   # inner-1 == -1 (cyclic)

    q2 = rope(q).astype(jnp.bfloat16)
    k2 = rope(k).astype(jnp.bfloat16)

    # Per (batch-in-tile, head) attention; each head's result retires straight
    # into the bf16 VMEM scratch (bounds live ranges; no trailing concat).
    dn = (((1,), (1,)), ((), ()))
    for bt in range(b_tile):            # static; b_tile kept small
        r0 = bt * n
        for h in range(heads):          # static; scratch writeback bounds liveness
            c0 = h * d
            q_h = q2[r0:r0 + n, c0:c0 + d]           # contiguous d-wide slices
            k_h = k2[r0:r0 + n, c0:c0 + d]
            v_h = v[r0:r0 + n, c0:c0 + d]

            # single score matmul contracting over the full head dim (K = d);
            # 1/sqrt(d) already folded into the Q weights.
            dots = jax.lax.dot_general(q_h, k_h, dn,
                                       preferred_element_type=jnp.float32)  # (n, n)

            m = jnp.max(dots, axis=-1, keepdims=True)
            p = jnp.exp(dots - m)
            inv = pl.reciprocal(jnp.sum(p, axis=-1, keepdims=True), approx=True)
            attn = (p * inv).astype(jnp.bfloat16)

            out_h = jnp.dot(attn, v_h, preferred_element_type=jnp.float32)  # (n, d)
            out_acc[pl.ds(r0, n), pl.ds(c0, d)] = out_h.astype(jnp.bfloat16)

    # One fused output projection over all heads + bias.
    o = jnp.dot(out_acc[...], wo_ref[...], preferred_element_type=jnp.float32)
    o = o + bo_ref[...]
    o_ref[...] = o.reshape(b_tile, n, dim).astype(o_ref.dtype)


# --------------------- one-time weight / freq preparation ---------------------
def prepare_rope_attention_params(w_qkv, w_out, b_out, cos, sin, *, heads, dim_heads):
    """Run ONCE per set of weights (not on the per-call hot path).

    w_qkv : (3*inner, dim) torch Linear weight (y = x @ W.T)
    w_out : (dim, inner)
    b_out : (dim,)
    cos/sin : (heads, n, d/2) per-head RoPE tables
    """
    inner = heads * dim_heads
    d = dim_heads
    dim = w_qkv.shape[1]
    scale = float(d) ** -0.5

    # Natural interleaved channel order; fold 1/sqrt(d) into the Q weights
    # (scale commutes with the rotation, which is linear in q).
    wq = w_qkv[:inner].T * scale                   # (dim, inner)
    wk = w_qkv[inner:2 * inner].T
    wv = w_qkv[2 * inner:].T
    wqkv = jnp.concatenate([wq, wk, wv], axis=1).astype(jnp.bfloat16)   # (dim, 3*inner)

    wo = w_out.T.astype(jnp.bfloat16)              # (inner, dim)
    bo = b_out.reshape(1, dim).astype(jnp.float32)

    # Full-width RoPE tables in natural interleaved order, stored bf16.
    n = cos.shape[1]

    def widen(t):  # (heads, n, d/2) -> (n, inner), each value duplicated per pair
        t2 = jnp.repeat(t, 2, axis=-1)             # (heads, n, d): v0,v0,v1,v1,...
        return t2.transpose(1, 0, 2).reshape(n, inner)

    cos_t = widen(cos)
    sin_w = widen(sin)
    is_even = (jnp.arange(inner) % 2 == 0)[None, :]
    sin_a = jnp.where(is_even, 0.0, sin_w)         # +sin on odd lanes
    sin_b = jnp.where(is_even, -sin_w, 0.0)        # -sin on even lanes
    return (wqkv, cos_t.astype(jnp.bfloat16), sin_a.astype(jnp.bfloat16),
            sin_b.astype(jnp.bfloat16), wo, bo)


# ------------------------------- wrapper -------------------------------------
def rope_attention_pallas(x, wqkv, cos_t, sin_a, sin_b, wo, bo,
                          *, heads, dim_heads, b_tile=1):
    b, n, dim = x.shape
    inner = heads * dim_heads
    assert b % b_tile == 0

    grid_spec = pltpu.PrefetchScalarGridSpec(
        num_scalar_prefetch=0,
        grid=(b // b_tile,),
        in_specs=[
            pl.BlockSpec((b_tile, n, dim), lambda i: (i, 0, 0)),   # x (f32, cast in-kernel)
            pl.BlockSpec((dim, 3 * inner), lambda i: (0, 0)),      # fused qkv weight (resident)
            pl.BlockSpec((n, inner), lambda i: (0, 0)),            # cos table (resident)
            pl.BlockSpec((n, inner), lambda i: (0, 0)),            # +sin (odd lanes)
            pl.BlockSpec((n, inner), lambda i: (0, 0)),            # -sin (even lanes)
            pl.BlockSpec((inner, dim), lambda i: (0, 0)),          # output proj weight
            pl.BlockSpec((1, dim), lambda i: (0, 0)),              # output proj bias
        ],
        out_specs=pl.BlockSpec((b_tile, n, dim), lambda i: (i, 0, 0)),
        scratch_shapes=[pltpu.VMEM((b_tile * n, inner), jnp.bfloat16)],
    )

    return pl.pallas_call(
        functools.partial(rope_attn_kernel, heads=heads, dim_heads=dim_heads,
                          inner=inner, b_tile=b_tile, n=n),
        out_shape=jax.ShapeDtypeStruct((b, n, dim), jnp.bfloat16),   # bf16 writeback
        grid_spec=grid_spec,
        compiler_params=pltpu.CompilerParams(
            dimension_semantics=("parallel",),
            vmem_limit_bytes=32 * 1024 * 1024),
    )(x, wqkv, cos_t, sin_a, sin_b, wo, bo)


# -------------------------- pure-JAX reference --------------------------------
def rope_attention_ref(x, w_qkv, w_out, b_out, cos, sin, *, heads, dim_heads):
    b, n, dim = x.shape
    scale = float(dim_heads) ** -0.5
    qkv = x @ w_qkv.T
    q, k, v = jnp.split(qkv, 3, axis=-1)

    def to_heads(t):
        return t.reshape(b, n, heads, dim_heads).transpose(0, 2, 1, 3)

    q, k, v = map(to_heads, (q, k, v))

    def rope(t):  # interleaved real/imag pairs, as torch.view_as_complex
        tr, ti = t[..., 0::2], t[..., 1::2]
        o_r = tr * cos[None] - ti * sin[None]
        o_i = tr * sin[None] + ti * cos[None]
        return jnp.stack([o_r, o_i], axis=-1).reshape(t.shape)

    q, k = rope(q), rope(k)
    dots = jnp.einsum('bhid,bhjd->bhij', q, k) * scale
    attn = jax.nn.softmax(dots, axis=-1)
    out = jnp.einsum('bhij,bhjd->bhid', attn, v)
    out = out.transpose(0, 2, 1, 3).reshape(b, n, heads * dim_heads)
    return out @ w_out.T + b_out


# ------------------------- RoPE freq construction -----------------------------
def build_freqs_cis(key, heads, dim_heads, end_x, end_y, theta=10.0):
    """RoPEUtils.init_2d_freqs + init_coords_xy -> per-head angles (h, n, d/2)."""
    half = dim_heads // 2
    mag = 1.0 / (theta ** (jnp.arange(0, dim_heads, 4)[: dim_heads // 4]
                           .astype(jnp.float32) / dim_heads))              # (d/4,)
    angles = jax.random.uniform(key, (heads, 1)) * 2.0 * jnp.pi            # rotate=True
    fx = jnp.concatenate([mag[None] * jnp.cos(angles),
                          mag[None] * jnp.cos(jnp.pi / 2 + angles)], axis=-1)  # (h, d/2)
    fy = jnp.concatenate([mag[None] * jnp.sin(angles),
                          mag[None] * jnp.sin(jnp.pi / 2 + angles)], axis=-1)  # (h, d/2)
    n = end_x * end_y
    t = jnp.arange(n, dtype=jnp.float32)
    t_x = t % end_x
    t_y = jnp.floor(t / end_x)
    angle = (t_x[None, :, None] * fx[:, None, :]
             + t_y[None, :, None] * fy[:, None, :])                        # (h, n, d/2)
    assert angle.shape == (heads, n, half)
    return jnp.cos(angle), jnp.sin(angle)


# --------------------------------- main ---------------------------------------
if __name__ == "__main__":
    # small shapes consistent with the module
    b, heads, dim_heads = 2, 4, 8
    dim = 32                    # model dim
    end_x = end_y = 4
    n = end_x * end_y           # 16 tokens

    key = jax.random.PRNGKey(0)
    kx, kqkv, kwo, kbo, kfreq = jax.random.split(key, 5)

    x = jax.random.normal(kx, (b, n, dim), dtype=jnp.float32)
    w_qkv = 0.02 * jax.random.normal(kqkv, (3 * heads * dim_heads, dim), dtype=jnp.float32)
    w_out = 0.02 * jax.random.normal(kwo, (dim, heads * dim_heads), dtype=jnp.float32)
    b_out = 0.02 * jax.random.normal(kbo, (dim,), dtype=jnp.float32)
    cos, sin = build_freqs_cis(kfreq, heads, dim_heads, end_x, end_y)

    # one-time weight / table prep (off the per-call hot path)
    params = prepare_rope_attention_params(w_qkv, w_out, b_out, cos, sin,
                                           heads=heads, dim_heads=dim_heads)

    # b_tile=1 keeps 2 parallel grid steps (v7x megacore); raise b_tile so that
    # b_tile*n is a multiple of 256 (128 on v5e) at production shapes.
    out = rope_attention_pallas(x, *params, heads=heads, dim_heads=dim_heads, b_tile=1)
    out = jax.block_until_ready(out)

    ref = rope_attention_ref(x, w_qkv, w_out, b_out, cos, sin,
                             heads=heads, dim_heads=dim_heads)
    # bf16 matmul inputs / cos-sin tables / output (f32 accumulation) +
    # approx reciprocal → looser tolerance vs the f32 reference.
    np.testing.assert_allclose(np.asarray(out.astype(jnp.float32)), np.asarray(ref),
                               rtol=3e-2, atol=5e-3)
    print("KERNEL_OK")
</pallas_src>

<mosaic_0001>
module attributes {stable_mosaic.version = 11 : i64} {
  func.func @rope_attn_kernel(%arg0: i32, %arg1: memref<1x16x32xf32, #tpu.memory_space<vmem>>, %arg2: memref<32x96xbf16, #tpu.memory_space<vmem>>, %arg3: memref<16x32xbf16, #tpu.memory_space<vmem>>, %arg4: memref<16x32xbf16, #tpu.memory_space<vmem>>, %arg5: memref<16x32xbf16, #tpu.memory_space<vmem>>, %arg6: memref<32x32xbf16, #tpu.memory_space<vmem>>, %arg7: memref<1x32xf32, #tpu.memory_space<vmem>>, %arg8: memref<1x16x32xbf16, #tpu.memory_space<vmem>>, %arg9: memref<16x32xbf16, #tpu.memory_space<vmem>>) attributes {dimension_semantics = [#tpu.dimension_semantics<parallel>], iteration_bounds = array<i64: 2>, scalar_prefetch = 0 : i64, scratch_operands = 1 : i64, tpu.core_type = #tpu.core_type<tc>, window_params = [{transform_indices = @transform_0, window_bounds = array<i64: 1, 16, 32>}, {pipeline_mode = #tpu.pipeline_mode<synchronous>, transform_indices = @transform_1, window_bounds = array<i64: 32, 96>}, {pipeline_mode = #tpu.pipeline_mode<synchronous>, transform_indices = @transform_2, window_bounds = array<i64: 16, 32>}, {pipeline_mode = #tpu.pipeline_mode<synchronous>, transform_indices = @transform_3, window_bounds = array<i64: 16, 32>}, {pipeline_mode = #tpu.pipeline_mode<synchronous>, transform_indices = @transform_4, window_bounds = array<i64: 16, 32>}, {pipeline_mode = #tpu.pipeline_mode<synchronous>, transform_indices = @transform_5, window_bounds = array<i64: 32, 32>}, {pipeline_mode = #tpu.pipeline_mode<synchronous>, transform_indices = @transform_6, window_bounds = array<i64: 1, 32>}, {transform_indices = @transform_7, window_bounds = array<i64: 1, 16, 32>}]} {
    %c0 = arith.constant 0 : index
    %c0_0 = arith.constant 0 : index
    %c0_1 = arith.constant 0 : index
    %0 = vector.load %arg1[%c0, %c0_0, %c0_1] : memref<1x16x32xf32, #tpu.memory_space<vmem>>, vector<1x16x32xf32>
    %1 = vector.shape_cast %0 : vector<1x16x32xf32> to vector<16x32xf32>
    %2 = arith.truncf %1 : vector<16x32xf32> to vector<16x32xbf16>
    %c0_2 = arith.constant 0 : index
    %c0_3 = arith.constant 0 : index
    %3 = vector.load %arg2[%c0_2, %c0_3] : memref<32x96xbf16, #tpu.memory_space<vmem>>, vector<32x96xbf16>
    %cst = arith.constant dense<0.000000e+00> : vector<16x96xf32>
    %4 = tpu.matmul %2, %3, %cst {dimension_numbers = #tpu.dot_dimension_numbers<[1], [0], [0], [1], [0, 0, 1, 1], [], []>} : vector<16x32xbf16>, vector<32x96xbf16>, vector<16x96xf32> -> vector<16x96xf32>
    %5 = vector.extract_strided_slice %4 {offsets = [0, 64], sizes = [16, 32], strides = [1, 1]} : vector<16x96xf32> to vector<16x32xf32>
    %6 = arith.truncf %5 : vector<16x32xf32> to vector<16x32xbf16>
    %7 = vector.extract_strided_slice %4 {offsets = [0, 0], sizes = [16, 32], strides = [1, 1]} : vector<16x96xf32> to vector<16x32xf32>
    %8 = vector.extract_strided_slice %4 {offsets = [0, 32], sizes = [16, 32], strides = [1, 1]} : vector<16x96xf32> to vector<16x32xf32>
    %c0_4 = arith.constant 0 : index
    %c0_5 = arith.constant 0 : index
    %9 = vector.load %arg3[%c0_4, %c0_5] : memref<16x32xbf16, #tpu.memory_space<vmem>>, vector<16x32xbf16>
    %10 = arith.extf %9 : vector<16x32xbf16> to vector<16x32xf32>
    %c0_6 = arith.constant 0 : index
    %c0_7 = arith.constant 0 : index
    %11 = vector.load %arg4[%c0_6, %c0_7] : memref<16x32xbf16, #tpu.memory_space<vmem>>, vector<16x32xbf16>
    %12 = arith.extf %11 : vector<16x32xbf16> to vector<16x32xf32>
    %c0_8 = arith.constant 0 : index
    %c0_9 = arith.constant 0 : index
    %13 = vector.load %arg5[%c0_8, %c0_9] : memref<16x32xbf16, #tpu.memory_space<vmem>>, vector<16x32xbf16>
    %14 = arith.extf %13 : vector<16x32xbf16> to vector<16x32xf32>
    %15 = arith.mulf %7, %10 : vector<16x32xf32>
    %c1_i32 = arith.constant 1 : i32
    %16 = tpu.dynamic_rotate %7 by %c1_i32 dim 1 : vector<16x32xf32>, i32 -> vector<16x32xf32>
    %17 = arith.mulf %16, %12 : vector<16x32xf32>
    %18 = arith.addf %15, %17 : vector<16x32xf32>
    %c31_i32 = arith.constant 31 : i32
    %19 = tpu.dynamic_rotate %7 by %c31_i32 dim 1 : vector<16x32xf32>, i32 -> vector<16x32xf32>
    %20 = arith.mulf %19, %14 : vector<16x32xf32>
    %21 = arith.addf %18, %20 : vector<16x32xf32>
    %22 = arith.truncf %21 : vector<16x32xf32> to vector<16x32xbf16>
    %23 = arith.mulf %8, %10 : vector<16x32xf32>
    %c1_i32_10 = arith.constant 1 : i32
    %24 = tpu.dynamic_rotate %8 by %c1_i32_10 dim 1 : vector<16x32xf32>, i32 -> vector<16x32xf32>
    %25 = arith.mulf %24, %12 : vector<16x32xf32>
    %26 = arith.addf %23, %25 : vector<16x32xf32>
    %c31_i32_11 = arith.constant 31 : i32
    %27 = tpu.dynamic_rotate %8 by %c31_i32_11 dim 1 : vector<16x32xf32>, i32 -> vector<16x32xf32>
    %28 = arith.mulf %27, %14 : vector<16x32xf32>
    %29 = arith.addf %26, %28 : vector<16x32xf32>
    %30 = arith.truncf %29 : vector<16x32xf32> to vector<16x32xbf16>
    %31 = vector.extract_strided_slice %22 {offsets = [0, 0], sizes = [16, 8], strides = [1, 1]} : vector<16x32xbf16> to vector<16x8xbf16>
    %32 = vector.extract_strided_slice %30 {offsets = [0, 0], sizes = [16, 8], strides = [1, 1]} : vector<16x32xbf16> to vector<16x8xbf16>
    %33 = vector.extract_strided_slice %6 {offsets = [0, 0], sizes = [16, 8], strides = [1, 1]} : vector<16x32xbf16> to vector<16x8xbf16>
    %cst_12 = arith.constant dense<0.000000e+00> : vector<16x16xf32>
    %34 = tpu.matmul %31, %32, %cst_12 {dimension_numbers = #tpu.dot_dimension_numbers<[1], [1], [0], [0], [0, 0, 1, 0], [], []>} : vector<16x8xbf16>, vector<16x8xbf16>, vector<16x16xf32> -> vector<16x16xf32>
    %cst_13 = arith.constant dense<0xFF800000> : vector<16xf32>
    %35 = vector.multi_reduction <maximumf>, %34, %cst_13 [1] : vector<16x16xf32> to vector<16xf32>
    %36 = vector.shape_cast %35 : vector<16xf32> to vector<16x1xf32>
    %37 = vector.broadcast %36 : vector<16x1xf32> to vector<16x16xf32>
    %38 = arith.subf %34, %37 : vector<16x16xf32>
    %39 = math.exp %38 : vector<16x16xf32>
    %cst_14 = arith.constant dense<0.000000e+00> : vector<16xf32>
    %40 = vector.multi_reduction <add>, %39, %cst_14 [1] : vector<16x16xf32> to vector<16xf32>
    %41 = vector.shape_cast %40 : vector<16xf32> to vector<16x1xf32>
    %42 = tpu.reciprocal %41 {approx = true} : vector<16x1xf32> -> vector<16x1xf32>
    %43 = vector.broadcast %42 : vector<16x1xf32> to vector<16x16xf32>
    %44 = arith.mulf %39, %43 : vector<16x16xf32>
    %45 = arith.truncf %44 : vector<16x16xf32> to vector<16x16xbf16>
    %cst_15 = arith.constant dense<0.000000e+00> : vector<16x8xf32>
    %46 = tpu.matmul %45, %33, %cst_15 {dimension_numbers = #tpu.dot_dimension_numbers<[1], [0], [0], [1], [0, 0, 1, 1], [], []>} : vector<16x16xbf16>, vector<16x8xbf16>, vector<16x8xf32> -> vector<16x8xf32>
    %47 = arith.truncf %46 : vector<16x8xf32> to vector<16x8xbf16>
    %c0_16 = arith.constant 0 : index
    %c0_17 = arith.constant 0 : index
    %48 = vector.load %arg9[%c0_16, %c0_17] : memref<16x32xbf16, #tpu.memory_space<vmem>>, vector<16x8xbf16>
    tpu.vector_store %arg9[%c0_16, %c0_17], %47 {strides = array<i32>} : memref<16x32xbf16, #tpu.memory_space<vmem>>, vector<16x8xbf16>,
    %49 = vector.extract_strided_slice %22 {offsets = [0, 8], sizes = [16, 8], strides = [1, 1]} : vector<16x32xbf16> to vector<16x8xbf16>
    %50 = vector.extract_strided_slice %30 {offsets = [0, 8], sizes = [16, 8], strides = [1, 1]} : vector<16x32xbf16> to vector<16x8xbf16>
    %51 = vector.extract_strided_slice %6 {offsets = [0, 8], sizes = [16, 8], strides = [1, 1]} : vector<16x32xbf16> to vector<16x8xbf16>
    %cst_18 = arith.constant dense<0.000000e+00> : vector<16x16xf32>
    %52 = tpu.matmul %49, %50, %cst_18 {dimension_numbers = #tpu.dot_dimension_numbers<[1], [1], [0], [0], [0, 0, 1, 0], [], []>} : vector<16x8xbf16>, vector<16x8xbf16>, vector<16x16xf32> -> vector<16x16xf32>
    %cst_19 = arith.constant dense<0xFF800000> : vector<16xf32>
    %53 = vector.multi_reduction <maximumf>, %52, %cst_19 [1] : vector<16x16xf32> to vector<16xf32>
    %54 = vector.shape_cast %53 : vector<16xf32> to vector<16x1xf32>
    %55 = vector.broadcast %54 : vector<16x1xf32> to vector<16x16xf32>
    %56 = arith.subf %52, %55 : vector<16x16xf32>
    %57 = math.exp %56 : vector<16x16xf32>
    %cst_20 = arith.constant dense<0.000000e+00> : vector<16xf32>
    %58 = vector.multi_reduction <add>, %57, %cst_20 [1] : vector<16x16xf32> to vector<16xf32>
    %59 = vector.shape_cast %58 : vector<16xf32> to vector<16x1xf32>
    %60 = tpu.reciprocal %59 {approx = true} : vector<16x1xf32> -> vector<16x1xf32>
    %61 = vector.broadcast %60 : vector<16x1xf32> to vector<16x16xf32>
    %62 = arith.mulf %57, %61 : vector<16x16xf32>
    %63 = arith.truncf %62 : vector<16x16xf32> to vector<16x16xbf16>
    %cst_21 = arith.constant dense<0.000000e+00> : vector<16x8xf32>
    %64 = tpu.matmul %63, %51, %cst_21 {dimension_numbers = #tpu.dot_dimension_numbers<[1], [0], [0], [1], [0, 0, 1, 1], [], []>} : vector<16x16xbf16>, vector<16x8xbf16>, vector<16x8xf32> -> vector<16x8xf32>
    %65 = arith.truncf %64 : vector<16x8xf32> to vector<16x8xbf16>
    %c0_22 = arith.constant 0 : index
    %c8 = arith.constant 8 : index
    %66 = vector.load %arg9[%c0_22, %c8] : memref<16x32xbf16, #tpu.memory_space<vmem>>, vector<16x8xbf16>
    tpu.vector_store %arg9[%c0_22, %c8], %65 {strides = array<i32>} : memref<16x32xbf16, #tpu.memory_space<vmem>>, vector<16x8xbf16>,
    %67 = vector.extract_strided_slice %22 {offsets = [0, 16], sizes = [16, 8], strides = [1, 1]} : vector<16x32xbf16> to vector<16x8xbf16>
    %68 = vector.extract_strided_slice %30 {offsets = [0, 16], sizes = [16, 8], strides = [1, 1]} : vector<16x32xbf16> to vector<16x8xbf16>
    %69 = vector.extract_strided_slice %6 {offsets = [0, 16], sizes = [16, 8], strides = [1, 1]} : vector<16x32xbf16> to vector<16x8xbf16>
    %cst_23 = arith.constant dense<0.000000e+00> : vector<16x16xf32>
    %70 = tpu.matmul %67, %68, %cst_23 {dimension_numbers = #tpu.dot_dimension_numbers<[1], [1], [0], [0], [0, 0, 1, 0], [], []>} : vector<16x8xbf16>, vector<16x8xbf16>, vector<16x16xf32> -> vector<16x16xf32>
    %cst_24 = arith.constant dense<0xFF800000> : vector<16xf32>
    %71 = vector.multi_reduction <maximumf>, %70, %cst_24 [1] : vector<16x16xf32> to vector<16xf32>
    %72 = vector.shape_cast %71 : vector<16xf32> to vector<16x1xf32>
    %73 = vector.broadcast %72 : vector<16x1xf32> to vector<16x16xf32>
    %74 = arith.subf %70, %73 : vector<16x16xf32>
    %75 = math.exp %74 : vector<16x16xf32>
    %cst_25 = arith.constant dense<0.000000e+00> : vector<16xf32>
    %76 = vector.multi_reduction <add>, %75, %cst_25 [1] : vector<16x16xf32> to vector<16xf32>
    %77 = vector.shape_cast %76 : vector<16xf32> to vector<16x1xf32>
    %78 = tpu.reciprocal %77 {approx = true} : vector<16x1xf32> -> vector<16x1xf32>
    %79 = vector.broadcast %78 : vector<16x1xf32> to vector<16x16xf32>
    %80 = arith.mulf %75, %79 : vector<16x16xf32>
    %81 = arith.truncf %80 : vector<16x16xf32> to vector<16x16xbf16>
    %cst_26 = arith.constant dense<0.000000e+00> : vector<16x8xf32>
    %82 = tpu.matmul %81, %69, %cst_26 {dimension_numbers = #tpu.dot_dimension_numbers<[1], [0], [0], [1], [0, 0, 1, 1], [], []>} : vector<16x16xbf16>, vector<16x8xbf16>, vector<16x8xf32> -> vector<16x8xf32>
    %83 = arith.truncf %82 : vector<16x8xf32> to vector<16x8xbf16>
    %c0_27 = arith.constant 0 : index
    %c16 = arith.constant 16 : index
    %84 = vector.load %arg9[%c0_27, %c16] : memref<16x32xbf16, #tpu.memory_space<vmem>>, vector<16x8xbf16>
    tpu.vector_store %arg9[%c0_27, %c16], %83 {strides = array<i32>} : memref<16x32xbf16, #tpu.memory_space<vmem>>, vector<16x8xbf16>,
    %85 = vector.extract_strided_slice %22 {offsets = [0, 24], sizes = [16, 8], strides = [1, 1]} : vector<16x32xbf16> to vector<16x8xbf16>
    %86 = vector.extract_strided_slice %30 {offsets = [0, 24], sizes = [16, 8], strides = [1, 1]} : vector<16x32xbf16> to vector<16x8xbf16>
    %87 = vector.extract_strided_slice %6 {offsets = [0, 24], sizes = [16, 8], strides = [1, 1]} : vector<16x32xbf16> to vector<16x8xbf16>
    %cst_28 = arith.constant dense<0.000000e+00> : vector<16x16xf32>
    %88 = tpu.matmul %85, %86, %cst_28 {dimension_numbers = #tpu.dot_dimension_numbers<[1], [1], [0], [0], [0, 0, 1, 0], [], []>} : vector<16x8xbf16>, vector<16x8xbf16>, vector<16x16xf32> -> vector<16x16xf32>
    %cst_29 = arith.constant dense<0xFF800000> : vector<16xf32>
    %89 = vector.multi_reduction <maximumf>, %88, %cst_29 [1] : vector<16x16xf32> to vector<16xf32>
    %90 = vector.shape_cast %89 : vector<16xf32> to vector<16x1xf32>
    %91 = vector.broadcast %90 : vector<16x1xf32> to vector<16x16xf32>
    %92 = arith.subf %88, %91 : vector<16x16xf32>
    %93 = math.exp %92 : vector<16x16xf32>
    %cst_30 = arith.constant dense<0.000000e+00> : vector<16xf32>
    %94 = vector.multi_reduction <add>, %93, %cst_30 [1] : vector<16x16xf32> to vector<16xf32>
    %95 = vector.shape_cast %94 : vector<16xf32> to vector<16x1xf32>
    %96 = tpu.reciprocal %95 {approx = true} : vector<16x1xf32> -> vector<16x1xf32>
    %97 = vector.broadcast %96 : vector<16x1xf32> to vector<16x16xf32>
    %98 = arith.mulf %93, %97 : vector<16x16xf32>
    %99 = arith.truncf %98 : vector<16x16xf32> to vector<16x16xbf16>
    %cst_31 = arith.constant dense<0.000000e+00> : vector<16x8xf32>
    %100 = tpu.matmul %99, %87, %cst_31 {dimension_numbers = #tpu.dot_dimension_numbers<[1], [0], [0], [1], [0, 0, 1, 1], [], []>} : vector<16x16xbf16>, vector<16x8xbf16>, vector<16x8xf32> -> vector<16x8xf32>
    %101 = arith.truncf %100 : vector<16x8xf32> to vector<16x8xbf16>
    %c0_32 = arith.constant 0 : index
    %c24 = arith.constant 24 : index
    %102 = vector.load %arg9[%c0_32, %c24] : memref<16x32xbf16, #tpu.memory_space<vmem>>, vector<16x8xbf16>
    tpu.vector_store %arg9[%c0_32, %c24], %101 {strides = array<i32>} : memref<16x32xbf16, #tpu.memory_space<vmem>>, vector<16x8xbf16>,
    %c0_33 = arith.constant 0 : index
    %c0_34 = arith.constant 0 : index
    %103 = vector.load %arg9[%c0_33, %c0_34] : memref<16x32xbf16, #tpu.memory_space<vmem>>, vector<16x32xbf16>
    %c0_35 = arith.constant 0 : index
    %c0_36 = arith.constant 0 : index
    %104 = vector.load %arg6[%c0_35, %c0_36] : memref<32x32xbf16, #tpu.memory_space<vmem>>, vector<32x32xbf16>
    %cst_37 = arith.constant dense<0.000000e+00> : vector<16x32xf32>
    %105 = tpu.matmul %103, %104, %cst_37 {dimension_numbers = #tpu.dot_dimension_numbers<[1], [0], [0], [1], [0, 0, 1, 1], [], []>} : vector<16x32xbf16>, vector<32x32xbf16>, vector<16x32xf32> -> vector<16x32xf32>
    %c0_38 = arith.constant 0 : index
    %c0_39 = arith.constant 0 : index
    %106 = vector.load %arg7[%c0_38, %c0_39] : memref<1x32xf32, #tpu.memory_space<vmem>>, vector<1x32xf32>
    %107 = vector.broadcast %106 : vector<1x32xf32> to vector<16x32xf32>
    %108 = arith.addf %105, %107 : vector<16x32xf32>
    %109 = vector.shape_cast %108 : vector<16x32xf32> to vector<1x16x32xf32>
    %110 = arith.truncf %109 : vector<1x16x32xf32> to vector<1x16x32xbf16>
    %c0_40 = arith.constant 0 : index
    %c0_41 = arith.constant 0 : index
    %c0_42 = arith.constant 0 : index
    %111 = vector.load %arg8[%c0_40, %c0_41, %c0_42] : memref<1x16x32xbf16, #tpu.memory_space<vmem>>, vector<1x16x32xbf16>
    tpu.vector_store %arg8[%c0_40, %c0_41, %c0_42], %110 {strides = array<i32>} : memref<1x16x32xbf16, #tpu.memory_space<vmem>>, vector<1x16x32xbf16>,
    return
  }
  func.func @transform_0(%arg0: i32) -> (i32, i32, i32) {
    %c0_i32 = arith.constant 0 : i32
    %c0_i32_0 = arith.constant 0 : i32
    %c0_i32_1 = arith.constant 0 : i32
    return %arg0, %c0_i32, %c0_i32_0 : i32, i32, i32
  }
  func.func @transform_1(%arg0: i32) -> (i32, i32) {
    %c0_i32 = arith.constant 0 : i32
    %c0_i32_0 = arith.constant 0 : i32
    %c0_i32_1 = arith.constant 0 : i32
    return %c0_i32, %c0_i32_0 : i32, i32
  }
  func.func @transform_2(%arg0: i32) -> (i32, i32) {
    %c0_i32 = arith.constant 0 : i32
    %c0_i32_0 = arith.constant 0 : i32
    %c0_i32_1 = arith.constant 0 : i32
    return %c0_i32, %c0_i32_0 : i32, i32
  }
  func.func @transform_3(%arg0: i32) -> (i32, i32) {
    %c0_i32 = arith.constant 0 : i32
    %c0_i32_0 = arith.constant 0 : i32
    %c0_i32_1 = arith.constant 0 : i32
    return %c0_i32, %c0_i32_0 : i32, i32
  }
  func.func @transform_4(%arg0: i32) -> (i32, i32) {
    %c0_i32 = arith.constant 0 : i32
    %c0_i32_0 = arith.constant 0 : i32
    %c0_i32_1 = arith.constant 0 : i32
    return %c0_i32, %c0_i32_0 : i32, i32
  }
  func.func @transform_5(%arg0: i32) -> (i32, i32) {
    %c0_i32 = arith.constant 0 : i32
    %c0_i32_0 = arith.constant 0 : i32
    %c0_i32_1 = arith.constant 0 : i32
    return %c0_i32, %c0_i32_0 : i32, i32
  }
  func.func @transform_6(%arg0: i32) -> (i32, i32) {
    %c0_i32 = arith.constant 0 : i32
    %c0_i32_0 = arith.constant 0 : i32
    %c0_i32_1 = arith.constant 0 : i32
    return %c0_i32, %c0_i32_0 : i32, i32
  }
  func.func @transform_7(%arg0: i32) -> (i32, i32, i32) {
    %c0_i32 = arith.constant 0 : i32
    %c0_i32_0 = arith.constant 0 : i32
    %c0_i32_1 = arith.constant 0 : i32
    return %arg0, %c0_i32, %c0_i32_0 : i32, i32, i32
  }
}

</mosaic_0001>

<bundles_post_ra>
// kernel: tpu_custom_call.1
= control target key start
LH: loop header
LB: loop body
LE: loop exit
PB: predicated region body
PF: predicated region fallthrough
CT: control target
= control target key end

     0   :  { %s2332_s0 = inlined_call_operand.hbm [shape: f32[2,16,32], index: 0, kind: input, shape index: {}]   ;;  %s2333_s1 = inlined_call_operand.hbm [shape: bf16[32,96], index: 1, kind: input, shape index: {}]   ;;  %s2334_s2 = inlined_call_operand.hbm [shape: bf16[16,32], index: 2, kind: input, shape index: {}]   ;;  %s2335_s3 = inlined_call_operand.hbm [shape: bf16[16,32], index: 3, kind: input, shape index: {}]   ;;  %s2336_s4 = inlined_call_operand.hbm [shape: bf16[16,32], index: 4, kind: input, shape index: {}]   ;;  %s2337_s5 = inlined_call_operand.hbm [shape: bf16[32,32], index: 5, kind: input, shape index: {}]   ;;  %s2338_s6 = inlined_call_operand.vmem [shape: f32[1,32], index: 6, kind: input, shape index: {}]   ;;  %s2339_s7 = inlined_call_operand.hbm [shape: bf16[2,16,32], index: 7, kind: output, shape index: {}]  }
   0x1   :  { %2344 = sst [smem:[#allocation20_spill]] %s2333_s1 }
   0x2   :  { %12 = vsyncpa [#allocation4], 0 }
   0x3   :  { %14 = vsyncpa [#allocation4 + $0x1], 0 }
   0x4   :  { %15 = vsyncpa [#allocation7], 0 }
   0x5   :  { %16 = vsyncpa [#allocation10], 0 }
   0x6   :  { %17 = vsyncpa [#allocation13], 0 }
   0x7   :  { %18 = vsyncpa [#allocation5], 0 }
   0x8   :  { %20 = vsyncpa [#allocation5 + $0x1], 0  ;;  %s1966_s24 = smov 0   ;;  %s1968_s25 = smov 0  }
   0x9   :  { %s1970_s26 = smov 0   ;;  %s1972_s27 = smov 0  }
   0xa LB: > { %s1893_s28 = smov [#allocation6]   ;;  %s1987_s30 = sadd.s32 4294967295, %s1891_s27   ;;  %s1891_s27 = sphi %s1972_s27, %s2367_s27   ;;  %s1887_s26 = sphi %s1970_s26, %s2366_s26   ;;  %s1883_s25 = sphi %s1968_s25, %s2365_s25   ;;  %s1879_s24 = sphi %s1966_s24, %s2364_s24  }
   0xb   : > { %s221_s29 = sshll.u32 %s1893_s28, 4  ;;  %p1323_p0 = scmp.ge.s32.totalorder %s1891_s27, 1  ;;  %s222_s29 = int_to_ptr.vmem [resolvable:$true] %s221_s29 }
   0xc   : > { %p2340_p1 = scmp.eq.s32.totalorder %s1987_s30, 0  ;;  %p209_p2 = scmp.lt.s32.totalorder %s1891_s27, 3 }
   0xd   : > { %s1894_s9 = smov [#allocation9]   ;;  %s1895_s12 = smov [#allocation8]  }
   0xe   : > { %p1992_p3 = pnand %p1323_p0, %p209_p2  ;;  %s247_s10 = sshll.u32 %s1894_s9, 4  ;;  %s2005_s10 = int_to_ptr.vmem [resolvable:$true] %s247_s10 }
   0xf   : > { %s234_s13 = sshll.u32 %s1895_s12, 4  ;;  %s1668_s15 = scalar_lea.vmem %s222_s29, 256  ;;  %s2007_s13 = int_to_ptr.vmem [resolvable:$true] %s234_s13 }
  0x10   : > { %s2345_s8 = scalar_select %p1992_p3, 1, 0 }
  0x11   : > { %p1506_p5 = pneg %p1992_p3  ;;  %p1669_p8 = scmp.ne.s32.totalorder %s222_s29, %s1668_s15 }
  0x12   : > { %p1676_p11 = scmp.lt.s32.totalorder %s222_s29, %s222_s29  ;;  %p1677_p12 = scmp.lt.s32.totalorder %s1668_s15, %s1668_s15 }
  0x13   : > { %p2001_p6 = pnand %p1506_p5, %p2340_p1 }
  0x14   : > { %p1678_p13 = por %p1677_p12, %p1676_p11 }
  0x15   : > { %p2011_p7 = pneg %p2001_p6 }
  0x17   : > { %p1671_p9 = pnand %p1669_p8, %p2011_p7 }
  0x19   : > { %p1672_p10 = pneg %p1671_p9 }
  0x1b   : > { %p1679_p0 = pnand %p1678_p13, %p1672_p10 }
  0x1d   : > { %1682 = shalt.err (!%p1679_p0)
}
  0x1e   : > { %s1896_s16 = smov 64   ;;  %s1897_s17 = smov 4  }
  0x1f   : > { %s2348_s1 = sld [smem:[#allocation20_spill]]  ;;  %s1694_s20 = scalar_lea.vmem %s2005_s10, 128 }
  0x20   : > { %p1695_p2 = scmp.ne.s32.totalorder %s2005_s10, %s1694_s20  ;;  %p1702_p9 = scmp.lt.s32.totalorder %s2005_s10, %s2005_s10 }
  0x21   : > { %p1703_p10 = scmp.lt.s32.totalorder %s1694_s20, %s1694_s20 }
  0x22   : > { %p1697_p5 = pnand %p1695_p2, %p2011_p7 }
  0x23   : > { %p1704_p11 = por %p1703_p10, %p1702_p9 }
  0x24   : > { %p1698_p8 = pneg %p1697_p5 }
  0x25   : > { %1509 = dma.hbm_to_vmem [thread:$0]  (!%p2001_p6), %s2348_s1, 256, %s222_s29, [#allocation7], %s1896_s16, %s1896_s16, %s1897_s17  }
  0x26   : > { %p1705_p12 = pnand %p1704_p11, %p1698_p8 }
  0x28   : > { %1708 = shalt.err (!%p1705_p12)
}
  0x29   : > { %1515 = dma.hbm_to_vmem [thread:$0]  (!%p2001_p6), %s2335_s3, 128, %s2005_s10, [#allocation10], %s1896_s16, %s1896_s16, %s1897_s17  }
  0x2a   : > { %s1720_s23 = scalar_lea.vmem %s2007_s13, 128  ;;  %p1728_p5 = scmp.lt.s32.totalorder %s2007_s13, %s2007_s13 }
  0x2b   : > { %p1721_p13 = scmp.ne.s32.totalorder %s2007_s13, %s1720_s23  ;;  %p1729_p8 = scmp.lt.s32.totalorder %s1720_s23, %s1720_s23 }
  0x2d   : > { %p1723_p0 = pnand %p1721_p13, %p2011_p7  ;;  %p1730_p9 = por %p1729_p8, %p1728_p5 }
  0x2f   : > { %p1724_p2 = pneg %p1723_p0 }
  0x31   : > { %p1731_p10 = pnand %p1730_p9, %p1724_p2 }
  0x33   : > { %1734 = shalt.err (!%p1731_p10)
}
  0x34   : > { %1512 = dma.hbm_to_vmem [thread:$0]  (!%p2001_p6), %s2334_s2, 128, %s2007_s13, [#allocation7], %s1896_s16, %s1896_s16, %s1897_s17  }
  0x35   : > { %s1898_s9 = smov [#allocation11]   ;;  %s1899_s12 = smov [#allocation12]  }
  0x36   : > { %s260_s10 = sshll.u32 %s1898_s9, 4  ;;  %s273_s15 = sshll.u32 %s1899_s12, 4  ;;  %s261_s10 = int_to_ptr.vmem [resolvable:$true] %s260_s10  ;;  %s274_s15 = int_to_ptr.vmem [resolvable:$true] %s273_s15 }
  0x37   : > { %s1746_s18 = scalar_lea.vmem %s261_s10, 128  ;;  %p1754_p0 = scmp.lt.s32.totalorder %s261_s10, %s261_s10 }
  0x38   : > { %p1747_p11 = scmp.ne.s32.totalorder %s261_s10, %s1746_s18  ;;  %p1755_p2 = scmp.lt.s32.totalorder %s1746_s18, %s1746_s18 }
  0x3a   : > { %p1749_p12 = pnand %p1747_p11, %p2011_p7  ;;  %p1756_p5 = por %p1755_p2, %p1754_p0 }
  0x3c   : > { %p1750_p13 = pneg %p1749_p12 }
  0x3e   : > { %p1757_p8 = pnand %p1756_p5, %p1750_p13 }
  0x40   : > { %1760 = shalt.err (!%p1757_p8)
}
  0x41   : > { %1518 = dma.hbm_to_vmem [thread:$0]  (!%p2001_p6), %s2336_s4, 128, %s261_s10, [#allocation10], %s1896_s16, %s1896_s16, %s1897_s17  }
  0x42   : > { %s1772_s20 = scalar_lea.vmem %s274_s15, 256  ;;  %p1780_p12 = scmp.lt.s32.totalorder %s274_s15, %s274_s15 }
  0x43   : > { %p1773_p9 = scmp.ne.s32.totalorder %s274_s15, %s1772_s20  ;;  %p1781_p0 = scmp.lt.s32.totalorder %s1772_s20, %s1772_s20 }
  0x45   : > { %p1775_p10 = pnand %p1773_p9, %p2011_p7  ;;  %p1782_p13 = por %p1781_p0, %p1780_p12 }
  0x47   : > { %p1776_p11 = pneg %p1775_p10 }
  0x49   : > { %p1783_p2 = pnand %p1782_p13, %p1776_p11 }
  0x4b   : > { %1786 = shalt.err (!%p1783_p2)
}
  0x4c   : > { %1521 = dma.hbm_to_vmem [thread:$0]  (!%p2001_p6), %s2337_s5, 256, %s274_s15, [#allocation13], %s1896_s16, %s1896_s16, %s1897_s17  }
  0x4d   : > { %s1322_s11 = sadd.s32 4294967294, %s1891_s27   ;;  %s2077_s14 = sadd.s32 1, %s1891_s27  }
  0x4e   : > { %s33_s23 = sadd.s32 1, %s1887_s26  ;;  %s30_s28 = ssub.s32 %s1891_s27, %s2077_s14 }
  0x4f   : > { %p40_p7 = scmp.ne.s32.totalorder %s1887_s26, %s1883_s25  ;;  %p31_p5 = scmp.eq.s32.totalorder %s30_s28, 0 }
  0x50   : > { %p41_p8 = scmp.eq.s32.totalorder %s1891_s27, 0  ;;  %p46_p9 = scmp.ne.s32.totalorder %s1883_s25, %s1879_s24 }
  0x51   : > { %p196_p10 = scmp.eq.s32.totalorder %s1987_s30, 1  ;;  %p202_p0 = scmp.eq.s32.totalorder %s1322_s11, 1 }
  0x52   : > { %s2089_s29 = scalar_select %p31_p5, %s1887_s26, %s33_s23  }
  0x53   : > { %p42_p11 = por %p41_p8, %p40_p7  ;;  %p2093_p12 = por %p2340_p1, %p46_p9 }
  0x54   : > { %p2097_p6 = por %p196_p10, %p40_p7  ;;  %p1535_p13 = scmp.lt.s32.totalorder %s1891_s27, 2 }
  0x55   : > { %s2349_s9 = scalar_select %p2093_p12, 1, 0 }
  0x56   : > { %s2350_s16 = scalar_select %p2097_p6, 1, 0 }
  0x57   : > { %s290_s17 = sand.u32 1, %s1887_s26   ;;  %p2103_p2 = por %p202_p0, %p46_p9 }
  0x58   : > { %s1330_s12 = sshll.u32 %s290_s17, 4  ;;  %s1372_s15 = sshll.u32 %s1891_s27, 8 }
  0x59   : > { %s2351_s10 = scalar_select %p2103_p2, 1, 0 }
  0x5a   : > { %s2111_s19 = scalar_lea.hbm %s2332_s0, %s1372_s15  ;;  %s294_s20 = scalar_lea.vmem [#allocation3], %s1330_s12 }
  0x5b   : > { %s301_s21 = sshll.u32 %s294_s20, 4  ;;  %p2113_p7 = pnand %p1535_p13, %p42_p11  ;;  %s2117_s21 = int_to_ptr.vmem [resolvable:$true] %s301_s21 }
  0x5c   : > { %s2119_s11 = scalar_lea.sflag [#allocation4], %s290_s17  ;;  %s1787_s23 = scalar_lea.hbm %s2111_s19, 256 }
  0x5d   : > { %p1788_p5 = scmp.ne.s32.totalorder %s2111_s19, %s1787_s23  ;;  %p1789_p8 = pneg %p2113_p7 }
  0x5e   : > { %s1792_s12 = scalar_lea.hbm %s2332_s0, 512  ;;  %p1793_p11 = scmp.lt.s32.totalorder %s2111_s19, %s2332_s0 }
  0x5f   : > { %p1790_p9 = pnand %p1789_p8, %p1788_p5  ;;  %p1794_p0 = scmp.lt.s32.totalorder %s1792_s12, %s1787_s23 }
  0x61   : > { %p1791_p10 = pneg %p1790_p9  ;;  %p1795_p13 = por %p1794_p0, %p1793_p11 }
  0x63   : > { %p1796_p4 = pnand %p1795_p13, %p1791_p10 }
  0x65   : > { %1799 = shalt.err (!%p1796_p4)
}
  0x66   : > { %s1800_s17 = scalar_lea.vmem %s2117_s21, 256  ;;  %s1900_s20 = smov [#allocation3]  }
  0x67   : > { %p1801_p1 = scmp.ne.s32.totalorder %s2117_s21, %s1800_s17  ;;  %s1805_s1 = sshll.u32 %s1900_s20, 4  ;;  %s1806_s1 = int_to_ptr.vmem [resolvable:$false] %s1805_s1 }
  0x68   : > { %s1807_s28 = scalar_lea.vmem %s1806_s1, 512  ;;  %p1808_p9 = scmp.lt.s32.totalorder %s2117_s21, %s1806_s1 }
  0x69   : > { %p1803_p2 = pnand %p1801_p1, %p1789_p8  ;;  %p1809_p6 = scmp.lt.s32.totalorder %s1807_s28, %s1800_s17 }
  0x6b   : > { %p1804_p5 = pneg %p1803_p2  ;;  %p1810_p12 = por %p1809_p6, %p1808_p9 }
  0x6d   : > { %p1811_p3 = pnand %p1810_p12, %p1804_p5 }
  0x6f   : > { %1814 = shalt.err (!%p1811_p3)
}
  0x70   : > { %s1901_s23 = smov 128   ;;  %s1902_s15 = smov 8  }
  0x71   : > { %1525 = dma.hbm_to_vmem [thread:$0]  (!%p2113_p7), %s2111_s19, 256, %s2117_s21, %s2119_s11, %s1901_s23, %s1901_s23, %s1902_s15  }
  0x72   : > { %p2353_p1 = scmp.ne.s32.totalorder %s2345_s8, 0 }
  0x73   : > { %s2143_s12 = sand.u32 (!%p2353_p1), 1, %s1883_s25   ;;  %p2354_p3 = scmp.ne.s32.totalorder (!%p2353_p1), %s2349_s9, 0 }
  0x74   : > { %313 = sbr.rel (%p2353_p1) target bundleno = 2012 (0x7dc), region = 48  ;;  %s1334_s1 = sshll.u32 (!%p2353_p1), %s2143_s12, 4 }
  0x75   : > { %s316_s18 = scalar_lea.sflag (!%p2353_p1), [#allocation4], %s2143_s12  ;;  %s319_s13 = scalar_lea.vmem (!%p2353_p1), [#allocation3], %s1334_s1 }
  0x79   : > { %1858 = dma.done.wait (%p2354_p3), %s316_s18, 256  }
  0x7a   : > { %1860 = vsyncadd (%p2354_p3), %s316_s18, 4294967040  ;;  %p2355_p4 = scmp.eq.s32.totalorder %s1987_s30, 0 }
  0x7c   : > { %1862 = dma.done.wait (%p2355_p4), [#allocation7], 384   ;;  %p2356_p12 = pmov %p2355_p4 }
  0x7d   : > { %p2357_p6 = pmov %p2355_p4 }
  0x7e   : > { %1864 = vsyncadd (%p2356_p12), [#allocation7], 4294966912 }
  0x7f   : > { %1866 = dma.done.wait (%p2357_p6), [#allocation10], 256   ;;  %p2358_p2 = pmov %p2355_p4 }
  0x81   : > { %1868 = vsyncadd (%p2358_p2), [#allocation10], 4294967040  ;;  %p2359_p7 = pmov %p2358_p2 }
  0x82   : > { %p2360_p8 = pmov %p2358_p2 }
  0x83   : > { %1870 = dma.done.wait (%p2359_p7), [#allocation13], 256  }
  0x84   : > { %1872 = vsyncadd (%p2360_p8), [#allocation13], 4294967040  ;;  %v1903_v0 = vmov 0.0   ;;  %vm1904_vm0 = vmmov 0   ;;  %v1620_v1 = vld [vmem:[#allocation6 + $0x8] sm:$0xff]   ;;  %v1621_v2 = vld [vmem:[#allocation6] sm:$0xff]  }
  0x85   : > { %1418 = vmatprep.subr.bf16.mxu0 %v1903_v0  ;;  %1422 = vmatprep.mubr.msk.bf16.mxu0 %vm1904_vm0, %v1903_v0  ;;  %v371_v3 = vld [vmem:[%s319_s13] sm:$0xff]  ;;  %v372_v4 = vld [vmem:[%s319_s13 + $0x8] sm:$0xff]  ;;  %vm390_vm1 = vcmask 261120   ;;  %s1905_s8 = smov 96   ;;  %s1906_s9 = smov 32   ;;  %vm450_vm2 = vcmask 1047808  }
  0x86   : > { %1426 = vmatprep.subr.bf16.mxu1 %v1903_v0  ;;  %1428 = vmatprep.mubr.msk.bf16.mxu1 %vm1904_vm0, %v1903_v0  ;;  %v373_v5 = vpack.c.bf16 %v372_v4, %v371_v3  ;;  %v1389_v12 = vld [vmem:[#allocation9] sm:$0xff]   ;;  %v1393_v15 = vld [vmem:[#allocation11] sm:$0xff]   ;;  %v2191_v23 = vld [vmem:[#allocation8] sm:$0xff]   ;;  %s1907_s19 = smov 31   ;;  %s1908_s21 = smov 1   ;;  %vm562_vm3 = vcmask 64512  }
  0x87   : > { %1419 = vmatpush3.bf16.msra.mxu0 %v1620_v1  ;;  %v1390_v13 = vunpack.c.l.bf16 %v1389_v12  ;;  %v1391_v14 = vunpack.c.h.bf16 %v1389_v12  ;;  %v1394_v19 = vunpack.c.l.bf16 %v1393_v15  ;;  %v1395_v20 = vunpack.c.h.bf16 %v1393_v15  ;;  %s1909_s22 = smov 97   ;;  %s1910_s11 = smov 127  }
  0x88   : > { %1420 = vmatprep.subr.bf16.mxu0 %v1903_v0  ;;  %v1386_v26 = vunpack.c.l.bf16 %v2191_v23  ;;  %v1387_v27 = vunpack.c.h.bf16 %v2191_v23  ;;  %s1911_s17 = smov 88   ;;  %s1912_s20 = smov 80   ;;  %vm610_vm4 = vcmask 130048   ;;  %vm690_vm5 = vcmask 60416  }
  0x89   : > { %v1605_v18 = vpack.i.bf16 %v1391_v14, %v1390_v13  ;;  %v1610_v25 = vpack.i.bf16 %v1395_v20, %v1394_v19  ;;  %s1913_s28 = smov 72   ;;  %s1914_s23 = smov 120   ;;  %vm827_vm6 = vcmask 126016   ;;  %vm963_vm7 = vcmask 191616  }
  0x8a   : > { %v1615_v30 = vpack.i.bf16 %v1387_v27, %v1386_v26  ;;  %s1915_s15 = smov 112   ;;  %s1916_s1 = smov 104   ;;  %vm1099_vm8 = vcmask 257216   ;;  %vm1184_vm9 = vcmask 257024  }
  0x8b   : > { %1421 = vmatpush3.bf16.msra.mxu0 %v1621_v2  ;;  %s1917_s18 = smov 64   ;;  %s1918_s13 = smov 48  }
  0x8c   : > { %1432 = vmatprep.subr.bf16.mxu0 %v1903_v0  ;;  %p2361_p11 = scmp.ne.s32.totalorder %s2350_s16, 0 }
  0x8e   : > { %1423 = vmatmul.mubr.msk.bf16.vlgmr.msra.gmra.mxu0 %vm390_vm1, %v373_v5 }
  0x8f   : > { %1434 = vmatprep.mubr.msk.bf16.mxu0 %vm1904_vm0, %v1903_v0 }
 0x14e   : > { %v2174_v6 = vpop.f32.mrf.mxu0 }
 0x14f   : > { %516 = vrot.lane.b32.xlu0 %v2174_v6, %s1905_s8 }
 0x150   : > { %v1424_v7 = vpop.f32.mrf.mxu0 }
 0x152   : > { %v2178_v8 = vpop.f32.mrf.mxu0 }
 0x153   : > { %518 = vrot.lane.b32.xlu0 %v2178_v8, %s1905_s8 }
 0x154   : > { %v1425_v9 = vpop.f32.mrf.mxu0 }
 0x155   : > { %v449_v9 = vmul.f32 %v1387_v27, %v2178_v8 }
 0x157   : > { %451 = vrot.lane.b32.xlu0 %v2174_v6, %s1906_s9 }
 0x1c1   : > { %v517_v10 = vpop.permute.xlu0 %516 }
 0x1c2   : > { %522 = vrot.lane.b32.xlu1 %v517_v10, %s1906_s9 }
 0x1c5   : > { %v519_v11 = vpop.permute.xlu0 %518 }
 0x1c6   : > { %525 = vrot.lane.b32.xlu1 %v519_v11, %s1906_s9 }
 0x1c9   : > { %v452_v24 = vpop.permute.xlu0 %451 }
 0x1ca   : > { %454 = vrot.lane.b32.xlu1 %v2178_v8, %s1906_s9  ;;  %v453_v28 = vsel %vm450_vm2, %v452_v24, %v2174_v6 }
 0x234   : > { %v523_v16 = vpop.permute.xlu1 %522 }
 0x235   : > { %v524_v17 = vsel %vm450_vm2, %v523_v16, %v517_v10 }
 0x236   : > { %528 = vrot.lane.b32.xlu0 %v524_v17, %s1906_s9 }
 0x238   : > { %v526_v21 = vpop.permute.xlu1 %525 }
 0x239   : > { %v527_v22 = vsel %vm450_vm2, %v526_v21, %v519_v11 }
 0x23a   : > { %1606 = vrot.lane.b32.xlu0 %v1605_v18, %s1907_s19  ;;  %530 = vrot.lane.b32.xlu1 %v527_v22, %s1906_s9 }
 0x23c   : > { %v455_v29 = vpop.permute.xlu1 %454 }
 0x23d   : > { %v456_v31 = vsel %vm450_vm2, %v455_v29, %v2178_v8 }
 0x23e   : > { %457 = vrot.lane.b32.xlu0 %v453_v28, %s1906_s9  ;;  %1611 = vrot.lane.b32.xlu1 %v1610_v25, %s1908_s21 }
 0x242   : > { %1616 = vrot.lane.b32.xlu0 %v1615_v30, %s1906_s9  ;;  %459 = vrot.lane.b32.xlu1 %v456_v31, %s1906_s9  ;;  %s1920_s9 = smov 56  }
 0x2a8   : > { %v529_v32 = vpop.permute.xlu0 %528 }
 0x2a9   : > { %v532_v38 = vsel %vm450_vm2, %v529_v32, %v517_v10  ;;  %v448_v10 = vmul.f32 %v1386_v26, %v2174_v6 }
 0x2ac   : > { %v1607_v33 = vpop.permute.xlu0 %1606  ;;  %v531_v34 = vpop.permute.xlu1 %530 }
 0x2ad   : > { %v1609_v35 = vunpack.i.h.bf16 %v1607_v33  ;;  %v1608_v36 = vunpack.i.l.bf16 %v1607_v33  ;;  %v533_v37 = vsel %vm450_vm2, %v531_v34, %v519_v11 }
 0x2af   : > { %v534_v39 = vmul.f32 %v1608_v36, %v532_v38  ;;  %v535_v40 = vmul.f32 %v1609_v35, %v533_v37 }
 0x2b0   : > { %v1612_v41 = vpop.permute.xlu1 %1611  ;;  %v458_v42 = vpop.permute.xlu0 %457 }
 0x2b1   : > { %v1614_v43 = vunpack.i.h.bf16 %v1612_v41  ;;  %v1613_v44 = vunpack.i.l.bf16 %v1612_v41  ;;  %538 = vrot.lane.b32.xlu1 %v534_v39, %s1908_s21  ;;  %540 = vrot.lane.b32.xlu0 %v535_v40, %s1908_s21  ;;  %v461_v47 = vsel %vm450_vm2, %v458_v42, %v2174_v6  ;;  %s1922_s21 = smov 16  }
 0x2b2   : > { %v471_v51 = vmul.f32 %v1608_v36, %v461_v47 }
 0x2b3   : > { %v547_v45 = vmul.f32 %v1614_v43, %v533_v37  ;;  %v546_v46 = vmul.f32 %v1613_v44, %v532_v38  ;;  %v491_v52 = vmul.f32 %v1613_v44, %v461_v47 }
 0x2b4   : > { %v460_v48 = vpop.permute.xlu1 %459  ;;  %v1617_v54 = vpop.permute.xlu0 %1616 }
 0x2b5   : > { %v462_v49 = vsel %vm450_vm2, %v460_v48, %v2178_v8  ;;  %552 = vrot.lane.b32.xlu0 %v547_v45, %s1907_s19  ;;  %550 = vrot.lane.b32.xlu1 %v546_v46, %s1907_s19  ;;  %v1619_v55 = vunpack.i.h.bf16 %v1617_v54  ;;  %v1618_v56 = vunpack.i.l.bf16 %v1617_v54  ;;  %s1921_s19 = smov 8  }
 0x2b6   : > { %v472_v50 = vmul.f32 %v1609_v35, %v462_v49  ;;  %v492_v53 = vmul.f32 %v1614_v43, %v462_v49 }
 0x2b7   : > { %v513_v59 = vmul.f32 %v1619_v55, %v2178_v8  ;;  %v512_v60 = vmul.f32 %v1618_v56, %v2174_v6 }
 0x2b9   : > { %477 = vrot.lane.b32.xlu0 %v472_v50, %s1909_s22  ;;  %475 = vrot.lane.b32.xlu1 %v471_v51, %s1909_s22  ;;  %s1923_s22 = smov 24  }
 0x2bd   : > { %497 = vrot.lane.b32.xlu0 %v492_v53, %s1910_s11  ;;  %495 = vrot.lane.b32.xlu1 %v491_v52, %s1910_s11  ;;  %v2247_v53 = vpack.c.bf16 %v2178_v8, %v2174_v6 }
 0x323   : > { %v541_v57 = vpop.permute.xlu0 %540  ;;  %v539_v58 = vpop.permute.xlu1 %538 }
 0x324   : > { %v545_v61 = vadd.f32 %v541_v57, %v513_v59  ;;  %v544_v62 = vadd.f32 %v539_v58, %v512_v60 }
 0x327   : > { %v553_v63 = vpop.permute.xlu0 %552  ;;  %v551_v1 = vpop.permute.xlu1 %550 }
 0x328   : > { %v557_v2 = vadd.f32 %v553_v63, %v545_v61  ;;  %v556_v3 = vadd.f32 %v551_v1, %v544_v62 }
 0x32a   : > { %v558_v4 = vpack.c.bf16 %v557_v2, %v556_v3 }
 0x32b   : > { %v478_v5 = vpop.permute.xlu0 %477  ;;  %v476_v7 = vpop.permute.xlu1 %475 }
 0x32c   : > { %696 = vrot.lane.b32.xlu0 %v558_v4, %s1911_s17  ;;  %560 = vrot.lane.b32.xlu1 %v558_v4, %s1905_s8  ;;  %v482_v11 = vadd.f32 %v478_v5, %v449_v9  ;;  %v481_v12 = vadd.f32 %v476_v7, %v448_v10  ;;  %s1919_s8 = smov 40  }
 0x32f   : > { %v498_v13 = vpop.permute.xlu0 %497  ;;  %v496_v14 = vpop.permute.xlu1 %495 }
 0x330   : > { %v502_v15 = vadd.f32 %v498_v13, %v482_v11  ;;  %v501_v16 = vadd.f32 %v496_v14, %v481_v12  ;;  %832 = vrot.lane.b32.xlu0 %v558_v4, %s1912_s20  ;;  %s1340_s20 = sshll.u32 %s2143_s12, 3 }
 0x332   : > { %v503_v17 = vpack.c.bf16 %v502_v15, %v501_v16 }
 0x334   : > { %968 = vrot.lane.b32.xlu0 %v558_v4, %s1913_s28  ;;  %694 = vrot.lane.b32.xlu1 %v503_v17, %s1914_s23  ;;  %s1383_s28 = sshll.u32 %s1987_s30, 7  ;;  %s369_s23 = scalar_lea.vmem [#allocation14], %s1340_s20 }
 0x338   : > { %830 = vrot.lane.b32.xlu1 %v503_v17, %s1915_s15  ;;  %s1201_s15 = sshll.u32 %s369_s23, 4  ;;  %s2287_s15 = int_to_ptr.vmem [resolvable:$true] %s1201_s15 }
 0x339   : > { %s1815_s30 = scalar_lea.vmem %s2287_s15, 128 }
 0x33a   : > { %p1816_p10 = scmp.ne.s32.totalorder %s2287_s15, %s1815_s30 }
 0x33c   : > { %966 = vrot.lane.b32.xlu1 %v503_v17, %s1916_s1  ;;  %p1817_p0 = pnand %p1816_p10, %p2361_p11 }
 0x33e   : > { %p1818_p13 = pneg %p1817_p0 }
 0x39e   : > { %v561_v18 = vpop.permute.xlu1 %560  ;;  %v697_v20 = vpop.permute.xlu0 %696 }
 0x39f   : > { %v567_v19 = vsel %vm562_vm3, %v561_v18, 0  ;;  %v702_v21 = vsel %vm562_vm3, %v697_v20, 0 }
 0x3a0   : > { %1427 = vmatpush3.bf16.xpose.msra.mxu1 %v567_v19 }
 0x3a1   : > { %1438 = vmatprep.subr.bf16.mxu1 %v1903_v0 }
 0x3a2   : > { %v833_v22 = vpop.permute.xlu0 %832 }
 0x3a3   : > { %v838_v24 = vsel %vm562_vm3, %v833_v22, 0 }
 0x3a6   : > { %v695_v23 = vpop.permute.xlu1 %694  ;;  %v969_v25 = vpop.permute.xlu0 %968 }
 0x3a7   : > { %1429 = vmatmul.mubr.msk.bf16.vlgmr.msra.gmra.mxu1 %vm562_vm3, %v503_v17  ;;  %v974_v27 = vsel %vm562_vm3, %v969_v25, 0 }
 0x3a8   : > { %1439 = vmatpush3.bf16.xpose.msra.mxu1 %v702_v21  ;;  %1440 = vmatprep.mubr.msk.bf16.mxu1 %vm1904_vm0, %v1903_v0 }
 0x3a9   : > { %1450 = vmatprep.subr.bf16.mxu1 %v1903_v0 }
 0x3aa   : > { %v831_v26 = vpop.permute.xlu1 %830 }
 0x3ae   : > { %v967_v28 = vpop.permute.xlu1 %966 }
 0x3af   : > { %1441 = vmatmul.mubr.msk.bf16.vlgmr.msra.gmra.mxu1 %vm562_vm3, %v695_v23 }
 0x3b0   : > { %1451 = vmatpush3.bf16.xpose.msra.mxu1 %v838_v24  ;;  %1452 = vmatprep.mubr.msk.bf16.mxu1 %vm1904_vm0, %v1903_v0 }
 0x3b1   : > { %1462 = vmatprep.subr.bf16.mxu1 %v1903_v0 }
 0x3b7   : > { %1453 = vmatmul.mubr.msk.bf16.vlgmr.msra.gmra.mxu1 %vm562_vm3, %v831_v26 }
 0x3b8   : > { %1463 = vmatpush3.bf16.xpose.msra.mxu1 %v974_v27  ;;  %1464 = vmatprep.mubr.msk.bf16.mxu1 %vm1904_vm0, %v1903_v0 }
 0x3b9   : > { %1474 = vmatprep.subr.bf16.mxu1 %v1903_v0 }
 0x3bf   : > { %1465 = vmatmul.mubr.msk.bf16.vlgmr.msra.gmra.mxu1 %vm562_vm3, %v967_v28 }
 0x3c0   : > { %1478 = vmatprep.mubr.msk.bf16.mxu1 %vm1904_vm0, %v1903_v0 }
 0x467   : > { %v603_v29 = vpop.f32.mrf.mxu1 }
 0x468   : > { %v611_v30 = vsel %vm610_vm4, %v603_v29, -inf }
 0x469   : > { %612 = vmax.xlane.f32.xlu0 %v611_v30  ;;  %v1430_v31 = vpop.f32.mrf.mxu1 }
 0x46b   : > { %v606_v32 = vpop.f32.mrf.mxu1 }
 0x46c   : > { %v614_v33 = vsel %vm610_vm4, %v606_v32, -inf }
 0x46d   : > { %615 = vmax.xlane.f32.xlu1 %v614_v33  ;;  %v1431_v34 = vpop.f32.mrf.mxu1 }
 0x46f   : > { %v738_v35 = vpop.f32.mrf.mxu1 }
 0x470   : > { %v745_v36 = vsel %vm610_vm4, %v738_v35, -inf }
 0x471   : > { %746 = vmax.xlane.f32.xlu0 %v745_v36  ;;  %v1442_v37 = vpop.f32.mrf.mxu1 }
 0x473   : > { %v741_v38 = vpop.f32.mrf.mxu1 }
 0x474   : > { %v748_v39 = vsel %vm610_vm4, %v741_v38, -inf }
 0x475   : > { %749 = vmax.xlane.f32.xlu0 %v748_v39  ;;  %v1443_v40 = vpop.f32.mrf.mxu1 }
 0x477   : > { %v874_v41 = vpop.f32.mrf.mxu1 }
 0x478   : > { %v881_v42 = vsel %vm610_vm4, %v874_v41, -inf }
 0x479   : > { %882 = vmax.xlane.f32.xlu1 %v881_v42  ;;  %v1454_v43 = vpop.f32.mrf.mxu1 }
 0x47b   : > { %v877_v44 = vpop.f32.mrf.mxu1 }
 0x47c   : > { %v884_v45 = vsel %vm610_vm4, %v877_v44, -inf }
 0x47d   : > { %885 = vmax.xlane.f32.xlu0 %v884_v45  ;;  %v1455_v46 = vpop.f32.mrf.mxu1 }
 0x47f   : > { %v1010_v47 = vpop.f32.mrf.mxu1 }
 0x480   : > { %v1017_v48 = vsel %vm610_vm4, %v1010_v47, -inf }
 0x481   : > { %1018 = vmax.xlane.f32.xlu1 %v1017_v48  ;;  %v1466_v49 = vpop.f32.mrf.mxu1 }
 0x483   : > { %v1013_v50 = vpop.f32.mrf.mxu1 }
 0x484   : > { %v1020_v51 = vsel %vm610_vm4, %v1013_v50, -inf }
 0x485   : > { %1021 = vmax.xlane.f32.xlu0 %v1020_v51  ;;  %v1467_v52 = vpop.f32.mrf.mxu1 }
 0x492   : > { %635 = vrot.lane.b32.xlu1 %v2247_v53, %s1917_s18 }
 0x4f2   : > { %v613_v54 = vpop.xlane.xlu0 %612 }
 0x4f3   : > { %v617_v55 = vsub.f32 %v603_v29, %v613_v54 }
 0x4f5   : > { %v619_v56 = vmul.f32 1.442695, %v617_v55 }
 0x4f6   : > { %v616_v57 = vpop.xlane.xlu1 %615 }
 0x4f7   : > { %1625 = vpow2.f32 %v619_v56  ;;  %v618_v58 = vsub.f32 %v606_v32, %v616_v57 }
 0x4f9   : > { %v621_v59 = vmul.f32 1.442695, %v618_v58 }
 0x4fa   : > { %v747_v60 = vpop.xlane.xlu0 %746 }
 0x4fb   : > { %1627 = vpow2.f32 %v621_v59  ;;  %v751_v61 = vsub.f32 %v738_v35, %v747_v60 }
 0x4fd   : > { %v753_v62 = vmul.f32 1.442695, %v751_v61 }
 0x4fe   : > { %v750_v63 = vpop.xlane.xlu0 %749 }
 0x4ff   : > { %1629 = vpow2.f32 %v753_v62  ;;  %v752_v1 = vsub.f32 %v741_v38, %v750_v63 }
 0x501   : > { %v755_v6 = vmul.f32 1.442695, %v752_v1 }
 0x502   : > { %v883_v8 = vpop.xlane.xlu1 %882 }
 0x503   : > { %1631 = vpow2.f32 %v755_v6  ;;  %v887_v2 = vsub.f32 %v874_v41, %v883_v8 }
 0x504   : > { %v1626_v3 = vpop.eup %1625 }
 0x505   : > { %v889_v4 = vmul.f32 1.442695, %v887_v2  ;;  %v623_v5 = vsel %vm610_vm4, %v1626_v3, 0.0 }
 0x506   : > { %v886_v7 = vpop.xlane.xlu0 %885  ;;  %624 = vadd.xlane.f32.xlu1 %v623_v5 }
 0x507   : > { %1633 = vpow2.f32 %v889_v4  ;;  %v888_v9 = vsub.f32 %v877_v44, %v886_v7 }
 0x508   : > { %v1628_v10 = vpop.eup %1627 }
 0x509   : > { %v891_v11 = vmul.f32 1.442695, %v888_v9  ;;  %v626_v12 = vsel %vm610_vm4, %v1628_v10, 0.0 }
 0x50a   : > { %v1019_v13 = vpop.xlane.xlu1 %1018  ;;  %627 = vadd.xlane.f32.xlu0 %v626_v12 }
 0x50b   : > { %1635 = vpow2.f32 %v891_v11  ;;  %v1023_v14 = vsub.f32 %v1010_v47, %v1019_v13 }
 0x50c   : > { %v1630_v15 = vpop.eup %1629 }
 0x50d   : > { %v1025_v16 = vmul.f32 1.442695, %v1023_v14  ;;  %v757_v17 = vsel %vm610_vm4, %v1630_v15, 0.0 }
 0x50e   : > { %v1022_v18 = vpop.xlane.xlu0 %1021  ;;  %758 = vadd.xlane.f32.xlu1 %v757_v17  ;;  %v636_v19 = vpop.permute.xlu1 %635  ;;  %v1623_v17 = vld [vmem:[#allocation12] sm:$0xff]  }
 0x50f   : > { %1637 = vpow2.f32 %v1025_v16  ;;  %v1024_v20 = vsub.f32 %v1013_v50, %v1022_v18  ;;  %1433 = vmatpush3.bf16.msra.mxu0 %v636_v19 }
 0x510   : > { %v1632_v21 = vpop.eup %1631  ;;  %1444 = vmatprep.subr.bf16.mxu0 %v1903_v0 }
 0x511   : > { %v1027_v22 = vmul.f32 1.442695, %v1024_v20  ;;  %v760_v23 = vsel %vm610_vm4, %v1632_v21, 0.0 }
 0x512   : > { %761 = vadd.xlane.f32.xlu0 %v760_v23 }
 0x513   : > { %1639 = vpow2.f32 %v1027_v22 }
 0x514   : > { %v1634_v24 = vpop.eup %1633 }
 0x515   : > { %v893_v25 = vsel %vm610_vm4, %v1634_v24, 0.0 }
 0x516   : > { %894 = vadd.xlane.f32.xlu1 %v893_v25 }
 0x518   : > { %v1636_v26 = vpop.eup %1635 }
 0x519   : > { %v896_v27 = vsel %vm610_vm4, %v1636_v26, 0.0 }
 0x51a   : > { %897 = vadd.xlane.f32.xlu0 %v896_v27 }
 0x51c   : > { %v1638_v28 = vpop.eup %1637 }
 0x51d   : > { %v1029_v29 = vsel %vm610_vm4, %v1638_v28, 0.0 }
 0x51e   : > { %1030 = vadd.xlane.f32.xlu1 %v1029_v29 }
 0x520   : > { %v1640_v30 = vpop.eup %1639 }
 0x521   : > { %v1032_v31 = vsel %vm610_vm4, %v1640_v30, 0.0 }
 0x522   : > { %1033 = vadd.xlane.f32.xlu0 %v1032_v31 }
 0x52f   : > { %904 = vrot.lane.b32.xlu1 %v2247_v53, %s1918_s13 }
 0x533   : > { %1040 = vrot.lane.b32.xlu1 %v2247_v53, %s1919_s8  ;;  %s2285_s8 = scalar_lea.hbm %s2339_s7, %s1383_s28 }
 0x538   : > { %768 = vrot.lane.b32.xlu0 %v2247_v53, %s1920_s9  ;;  %s1188_s9 = scalar_lea.sflag [#allocation5], %s2143_s12 }
 0x58f   : > { %v625_v32 = vpop.xlane.xlu1 %624 }
 0x590   : > { %1641 = vrcp.f32 %v625_v32  ;;  %v1360_v32 = vld [vmem:[%s2338_s6] ss:$0 sm:$0xff] }
 0x593   : > { %v628_v33 = vpop.xlane.xlu0 %627 }
 0x594   : > { %1643 = vrcp.f32 %v628_v33 }
 0x597   : > { %v759_v35 = vpop.xlane.xlu1 %758 }
 0x59b   : > { %v762_v34 = vpop.xlane.xlu0 %761 }
 0x59c   : > { %1645 = vrcp.f32 %v762_v34 }
 0x59d   : > { %v1642_v36 = vpop.eup %1641  ;;  %1647 = vrcp.f32 %v759_v35 }
 0x59e   : > { %v631_v38 = vmul.f32 %v1642_v36, %v1626_v3 }
 0x59f   : > { %v895_v41 = vpop.xlane.xlu1 %894 }
 0x5a1   : > { %v1644_v37 = vpop.eup %1643 }
 0x5a2   : > { %v632_v39 = vmul.f32 %v1644_v37, %v1628_v10 }
 0x5a3   : > { %v898_v40 = vpop.xlane.xlu0 %897 }
 0x5a4   : > { %v633_v42 = vpack.c.bf16 %v632_v39, %v631_v38  ;;  %1649 = vrcp.f32 %v898_v40 }
 0x5a5   : > { %1651 = vrcp.f32 %v895_v41 }
 0x5a6   : > { %1435 = vmatmul.mubr.msk.bf16.vlgmr.msra.gmra.mxu0 %vm610_vm4, %v633_v42 }
 0x5a7   : > { %1446 = vmatprep.mubr.msk.bf16.mxu0 %vm1904_vm0, %v1903_v0  ;;  %v1031_v46 = vpop.xlane.xlu1 %1030 }
 0x5a9   : > { %v1646_v43 = vpop.eup %1645 }
 0x5aa   : > { %v1648_v45 = vpop.eup %1647  ;;  %v766_v47 = vmul.f32 %v1646_v43, %v1632_v21 }
 0x5ab   : > { %v1034_v44 = vpop.xlane.xlu0 %1033  ;;  %v765_v49 = vmul.f32 %v1648_v45, %v1630_v15  ;;  %v905_v52 = vpop.permute.xlu1 %904  ;;  %v1622_v15 = vld [vmem:[#allocation12 + $0x8] sm:$0xff]  }
 0x5ac   : > { %1653 = vrcp.f32 %v1034_v44  ;;  %1475 = vmatpush3.bf16.msra.mxu1 %v1622_v15 }
 0x5ad   : > { %1655 = vrcp.f32 %v1031_v46  ;;  %v767_v50 = vpack.c.bf16 %v766_v47, %v765_v49  ;;  %1476 = vmatprep.subr.bf16.mxu1 %v1903_v0 }
 0x5af   : > { %v769_v48 = vpop.permute.xlu0 %768  ;;  %v1041_v58 = vpop.permute.xlu1 %1040 }
 0x5b0   : > { %1445 = vmatpush3.bf16.msra.mxu0 %v769_v48  ;;  %1477 = vmatpush3.bf16.msra.mxu1 %v1623_v17 }
 0x5b1   : > { %1456 = vmatprep.subr.bf16.mxu0 %v1903_v0  ;;  %v1650_v51 = vpop.eup %1649 }
 0x5b2   : > { %v1652_v53 = vpop.eup %1651  ;;  %v902_v54 = vmul.f32 %v1650_v51, %v1636_v26 }
 0x5b3   : > { %1447 = vmatmul.mubr.msk.bf16.vlgmr.msra.gmra.mxu0 %vm610_vm4, %v767_v50  ;;  %v901_v55 = vmul.f32 %v1652_v53, %v1634_v24 }
 0x5b4   : > { %1457 = vmatpush3.bf16.msra.mxu0 %v905_v52  ;;  %1458 = vmatprep.mubr.msk.bf16.mxu0 %vm1904_vm0, %v1903_v0 }
 0x5b5   : > { %1468 = vmatprep.subr.bf16.mxu0 %v1903_v0  ;;  %v903_v56 = vpack.c.bf16 %v902_v54, %v901_v55 }
 0x5b9   : > { %v1654_v57 = vpop.eup %1653 }
 0x5ba   : > { %v1656_v59 = vpop.eup %1655  ;;  %v1038_v60 = vmul.f32 %v1654_v57, %v1640_v30 }
 0x5bb   : > { %1459 = vmatmul.mubr.msk.bf16.vlgmr.msra.gmra.mxu0 %vm610_vm4, %v903_v56  ;;  %v1037_v61 = vmul.f32 %v1656_v59, %v1638_v28 }
 0x5bc   : > { %1469 = vmatpush3.bf16.msra.mxu0 %v1041_v58  ;;  %1470 = vmatprep.mubr.msk.bf16.mxu0 %vm1904_vm0, %v1903_v0 }
 0x5bd   : > { %v1039_v62 = vpack.c.bf16 %v1038_v60, %v1037_v61 }
 0x5c3   : > { %1471 = vmatmul.mubr.msk.bf16.vlgmr.msra.gmra.mxu0 %vm610_vm4, %v1039_v62 }
 0x666   : > { %v675_v63 = vpop.f32.mrf.mxu0 }
 0x667   : > { %v1373_v1 = vpack.c.bf16 %v675_v63, %v675_v63 }
 0x668   : > { %v1436_v6 = vpop.f32.mrf.mxu0 }
 0x669   : > { %691 = vst.msk [vmem:[#allocation2] sm:$0xf] %vm690_vm5, %v1373_v1 }
 0x66a   : > { %v678_v8 = vpop.f32.mrf.mxu0 }
 0x66b   : > { %v1374_v2 = vpack.c.bf16 %v678_v8, %v678_v8 }
 0x66c   : > { %v1437_v3 = vpop.f32.mrf.mxu0 }
 0x66d   : > { %692 = vst.msk [vmem:[#allocation2 + $0x4] sm:$0xf] %vm690_vm5, %v1374_v2 }
 0x673   : > { %v808_v4 = vpop.f32.mrf.mxu0 }
 0x674   : > { %v1375_v5 = vpack.c.bf16 %v808_v4, %v808_v4 }
 0x675   : > { %v1448_v7 = vpop.f32.mrf.mxu0 }
 0x676   : > { %821 = vrot.lane.b32.xlu0 %v1375_v5, %s1921_s19 }
 0x677   : > { %v811_v9 = vpop.f32.mrf.mxu0 }
 0x678   : > { %v1376_v10 = vpack.c.bf16 %v811_v9, %v811_v9 }
 0x679   : > { %v1449_v11 = vpop.f32.mrf.mxu0 }
 0x67a   : > { %823 = vrot.lane.b32.xlu1 %v1376_v10, %s1921_s19  ;;  %s1924_s19 = smov [#allocation14]  }
 0x67b   : > { %v944_v12 = vpop.f32.mrf.mxu0 }
 0x67c   : > { %v1377_v13 = vpack.c.bf16 %v944_v12, %v944_v12 }
 0x67d   : > { %v1460_v14 = vpop.f32.mrf.mxu0 }
 0x67e   : > { %957 = vrot.lane.b32.xlu0 %v1377_v13, %s1922_s21 }
 0x67f   : > { %v947_v16 = vpop.f32.mrf.mxu0 }
 0x680   : > { %v1378_v18 = vpack.c.bf16 %v947_v16, %v947_v16 }
 0x681   : > { %v1461_v19 = vpop.f32.mrf.mxu0 }
 0x682   : > { %959 = vrot.lane.b32.xlu1 %v1378_v18, %s1922_s21  ;;  %s1819_s21 = sshll.u32 %s1924_s19, 4  ;;  %s1820_s21 = int_to_ptr.vmem [resolvable:$false] %s1819_s21 }
 0x683   : > { %v1080_v20 = vpop.f32.mrf.mxu0  ;;  %p1822_p5 = scmp.lt.s32.totalorder %s2287_s15, %s1820_s21 }
 0x684   : > { %v1379_v21 = vpack.c.bf16 %v1080_v20, %v1080_v20 }
 0x685   : > { %v1472_v22 = vpop.f32.mrf.mxu0 }
 0x686   : > { %1093 = vrot.lane.b32.xlu0 %v1379_v21, %s1923_s22 }
 0x687   : > { %v1083_v23 = vpop.f32.mrf.mxu0 }
 0x688   : > { %v1380_v24 = vpack.c.bf16 %v1083_v23, %v1083_v23 }
 0x689   : > { %v1473_v25 = vpop.f32.mrf.mxu0 }
 0x68a   : > { %1095 = vrot.lane.b32.xlu1 %v1380_v24, %s1923_s22  ;;  %s1821_s22 = scalar_lea.vmem %s1820_s21, 256 }
 0x68b   : > { %p1823_p9 = scmp.lt.s32.totalorder %s1821_s22, %s1815_s30 }
 0x68d   : > { %p1824_p1 = por %p1823_p9, %p1822_p5 }
 0x68f   : > { %p1825_p3 = pnand %p1824_p1, %p1818_p13 }
 0x6e8   : > { %v822_v26 = vpop.permute.xlu0 %821 }
 0x6e9   : > { %828 = vst.msk [vmem:[#allocation2] sm:$0xf] %vm827_vm6, %v822_v26 }
 0x6ec   : > { %v824_v27 = vpop.permute.xlu1 %823 }
 0x6ed   : > { %829 = vst.msk [vmem:[#allocation2 + $0x4] sm:$0xf] %vm827_vm6, %v824_v27 }
 0x6f0   : > { %v958_v0 = vpop.permute.xlu0 %957 }
 0x6f1   : > { %964 = vst.msk [vmem:[#allocation2] sm:$0xf] %vm963_vm7, %v958_v0 }
 0x6f4   : > { %v960_v28 = vpop.permute.xlu1 %959 }
 0x6f5   : > { %965 = vst.msk [vmem:[#allocation2 + $0x4] sm:$0xf] %vm963_vm7, %v960_v28 }
 0x6f8   : > { %v1094_v29 = vpop.permute.xlu0 %1093 }
 0x6f9   : > { %1100 = vst.msk [vmem:[#allocation2] sm:$0xf] %vm1099_vm8, %v1094_v29 }
 0x6fc   : > { %v1096_v30 = vpop.permute.xlu1 %1095 }
 0x6fd   : > { %1101 = vst.msk [vmem:[#allocation2 + $0x4] sm:$0xf] %vm1099_vm8, %v1096_v30 }
 0x704   : > { %v1624_v31 = vld [vmem:[#allocation2] sm:$0xff]  }
 0x705   : > { %1479 = vmatmul.mubr.msk.bf16.vlgmr.msra.gmra.mxu1 %vm390_vm1, %v1624_v31 }
 0x7c5   : > { %v1169_v33 = vpop.f32.mrf.mxu1 }
 0x7c6   : > { %v1170_v34 = vadd.f32 %v1360_v32, %v1169_v33 }
 0x7c7   : > { %v1480_v35 = vpop.f32.mrf.mxu1 }
 0x7c8   : > { %v1381_v36 = vpack.c.bf16 %v1170_v34, %v1170_v34 }
 0x7c9   : > { %v1172_v37 = vpop.f32.mrf.mxu1 }
 0x7ca   : > { %1185 = vst.msk [vmem:[%s369_s23] sm:$0xf] %vm1184_vm9, %v1381_v36  ;;  %v1173_v38 = vadd.f32 %v1360_v32, %v1172_v37 }
 0x7cb   : > { %v1481_v39 = vpop.f32.mrf.mxu1 }
 0x7cc   : > { %v1382_v40 = vpack.c.bf16 %v1173_v38, %v1173_v38 }
 0x7ce   : > { %1186 = vst.msk [vmem:[%s369_s23 + $0x4] sm:$0xf] %vm1184_vm9, %v1382_v40 }
 0x7cf   : > { %1828 = shalt.err (!%p1825_p3)
}
 0x7d0   : > { %s1829_s11 = scalar_lea.hbm %s2285_s8, 128  ;;  %s1833_s28 = scalar_lea.hbm %s2339_s7, 256 }
 0x7d1   : > { %p1830_p4 = scmp.ne.s32.totalorder %s2285_s8, %s1829_s11  ;;  %p1834_p2 = scmp.lt.s32.totalorder %s2285_s8, %s2339_s7 }
 0x7d2   : > { %p1835_p7 = scmp.lt.s32.totalorder %s1833_s28, %s1829_s11 }
 0x7d3   : > { %p1831_p12 = pnand %p1830_p4, %p2361_p11 }
 0x7d4   : > { %p1836_p8 = por %p1835_p7, %p1834_p2 }
 0x7d5   : > { %p1832_p6 = pneg %p1831_p12 }
 0x7d7   : > { %p1837_p10 = pnand %p1836_p8, %p1832_p6 }
 0x7d9   : > { %1840 = shalt.err (!%p1837_p10)
}
 0x7da   : > { %s1925_s13 = smov 4  }
 0x7db   : > { %1504 = dma.vmem_to_hbm [thread:$0]  (%p2361_p11), %s2287_s15, 128, %s2285_s8, %s1188_s9, %s1917_s18, %s1917_s18, %s1925_s13  }
 0x7dc PF: > { %s1216_s30 = sand.u32 1, %s1879_s24   ;;  %p2362_p0 = scmp.ne.s32.totalorder %s2351_s10, 0 }
 0x7dd   : > { %p2363_p13 = scmp.ge.s32.totalorder %s1891_s27, 2  ;;  %s1217_s19 = scalar_lea.sflag [#allocation5], %s1216_s30 }
 0x7df   : > { %p1527_p5 = pnand %p2363_p13, %p2362_p0 }
 0x7e1   : > { %p1528_p9 = pneg %p1527_p5 }
 0x7e3   : > { %1874 = dma.done.wait (%p1528_p9), %s1217_s19, 128  }
 0x7e4   : > { %1876 = vsyncadd (%p1528_p9), %s1217_s19, 4294967168  ;;  %p23_p1 = scmp.ge.s32.totalorder %s2077_s14, 4   ;;  %s2364_s24 = smov %s1883_s25 }
 0x7e5   : > { %s2365_s25 = smov %s1887_s26  ;;  %s2366_s26 = smov %s2089_s29 }
 0x7e6   : > { %s2367_s27 = smov %s2077_s14  ;;  %25 = sbr.rel (!%p23_p1) target bundleno = 10 (0xa), region = 113 }
 0x7eb   :  { %1222 = vsyncpa [#allocation4], 1 }
 0x7ec   :  { %1224 = vsyncpa [#allocation4 + $0x1], 1 }
 0x7ed   :  { %1225 = vsyncpa [#allocation7], 1 }
 0x7ee   :  { %1226 = vsyncpa [#allocation10], 1 }
 0x7ef   :  { %1227 = vsyncpa [#allocation13], 1 }
 0x7f0   :  { %1228 = vsyncpa [#allocation5], 1 }
 0x7f1   :  { %1230 = vsyncpa [#allocation5 + $0x1], 1 }

</bundles_post_ra>
